<compile_context>
chip_gen: v7x
topology: tpu7x:2x2x1
jax: 0.10.0
libtpu: 0.0.40
codegen_flags: <defaults>
</compile_context>

<pallas_src>
import functools

import jax
import jax.numpy as jnp
from jax.experimental import pallas as pl
from jax.experimental.pallas import tpu as pltpu


def ffn_kernel(x_ref, w1_ref, b1_ref, w2_ref, p2_ref, out_ref, *, eps):
    # x_ref: (TM, E) f32 token tile; w1_ref: (E, H) bf16; b1_ref: (1, H) f32;
    # w2_ref: (H, E) bf16; p2_ref: (3, E) f32 = [fc2 bias; ln gamma; ln beta].
    x = x_ref[...]                                              # keep f32 copy for residual

    # fc1 + bias + ReLU  (bf16 MXU inputs, f32 accumulate)
    h = jnp.dot(x.astype(jnp.bfloat16), w1_ref[...],
                preferred_element_type=jnp.float32)
    h = jnp.maximum(h + b1_ref[...], 0.0)

    # fc2 + bias ; dropout = identity in eval mode ; residual add
    y = jnp.dot(h.astype(jnp.bfloat16), w2_ref[...],
                preferred_element_type=jnp.float32)
    y = y + p2_ref[0:1, :] + x

    # LayerNorm over the last (embed) dim, per token
    mu = jnp.mean(y, axis=-1, keepdims=True)
    yc = y - mu
    var = jnp.mean(yc * yc, axis=-1, keepdims=True)
    out_ref[...] = (p2_ref[1:2, :] * yc) * jax.lax.rsqrt(var + eps) + p2_ref[2:3, :]


def ffn_forward(x, params, *, tm=256, eps=1e-5):
    """x: (B, S, E) float.  params use PyTorch Linear/LayerNorm layouts."""
    B, S, E = x.shape
    H = params["fc1_w"].shape[0]                # PyTorch Linear weight is (out, in)
    N = B * S

    # Token tile: multiple of 8 (sublane), capped so small inputs fit one tile.
    tm = min(tm, max(8, ((N + 7) // 8) * 8))
    Np = ((N + tm - 1) // tm) * tm              # pad token axis to a tile multiple

    x2 = x.reshape(N, E).astype(jnp.float32)
    if Np != N:
        x2 = jnp.pad(x2, ((0, Np - N), (0, 0)))

    w1 = jnp.transpose(params["fc1_w"]).astype(jnp.bfloat16)    # (E, H)
    b1 = params["fc1_b"].reshape(1, H).astype(jnp.float32)
    w2 = jnp.transpose(params["fc2_w"]).astype(jnp.bfloat16)    # (H, E)
    p2 = jnp.stack([params["fc2_b"], params["ln_w"], params["ln_b"]]
                   ).astype(jnp.float32)                        # (3, E) packed vectors

    grid = (Np // tm,)
    out = pl.pallas_call(
        functools.partial(ffn_kernel, eps=eps),
        out_shape=jax.ShapeDtypeStruct((Np, E), jnp.float32),
        grid_spec=pltpu.PrefetchScalarGridSpec(
            num_scalar_prefetch=0,
            grid=grid,
            in_specs=[
                pl.BlockSpec((tm, E), lambda i: (i, 0)),        # token tile
                pl.BlockSpec((E, H), lambda i: (0, 0)),         # fc1 weight (resident)
                pl.BlockSpec((1, H), lambda i: (0, 0)),         # fc1 bias
                pl.BlockSpec((H, E), lambda i: (0, 0)),         # fc2 weight (resident)
                pl.BlockSpec((3, E), lambda i: (0, 0)),         # [fc2 bias, ln gamma, ln beta]
            ],
            out_specs=pl.BlockSpec((tm, E), lambda i: (i, 0)),
        ),
        compiler_params=pltpu.CompilerParams(
            dimension_semantics=("parallel",)),
    )(x2, w1, b1, w2, p2)
    return out[:N].reshape(B, S, E)


def ffn_reference(x, params, eps=1e-5):
    """Pure-JAX f32 reference mirroring the PyTorch eval-mode forward."""
    h = jnp.maximum(jnp.einsum('bse,he->bsh', x, params["fc1_w"]) + params["fc1_b"], 0.0)
    y = jnp.einsum('bsh,eh->bse', h, params["fc2_w"]) + params["fc2_b"]
    y = x + y
    mu = jnp.mean(y, axis=-1, keepdims=True)
    var = jnp.mean((y - mu) ** 2, axis=-1, keepdims=True)
    return params["ln_w"] * (y - mu) / jnp.sqrt(var + eps) + params["ln_b"]


if __name__ == "__main__":
    B, S, E, H = 2, 16, 128, 256   # batch, seq, embed_dim, hidden_dim (lane-dense E)

    key = jax.random.PRNGKey(0)
    ks = jax.random.split(key, 7)
    params = {
        "fc1_w": 0.1 * jax.random.normal(ks[0], (H, E), jnp.float32),
        "fc1_b": 0.1 * jax.random.normal(ks[1], (H,), jnp.float32),
        "fc2_w": 0.1 * jax.random.normal(ks[2], (E, H), jnp.float32),
        "fc2_b": 0.1 * jax.random.normal(ks[3], (E,), jnp.float32),
        "ln_w": 1.0 + 0.1 * jax.random.normal(ks[4], (E,), jnp.float32),
        "ln_b": 0.1 * jax.random.normal(ks[5], (E,), jnp.float32),
    }
    x = jax.random.normal(ks[6], (B, S, E), jnp.float32)

    out = jax.block_until_ready(ffn_forward(x, params))
    assert out.shape == (B, S, E), out.shape

    ref = ffn_reference(x, params)
    # bf16 MXU inputs (f32 accumulate) -> allow ~1% numeric slack vs the f32 reference.
    if not bool(jnp.allclose(out, ref, rtol=2e-2, atol=2e-2)):
        raise AssertionError("Pallas kernel does not match reference")

    print("KERNEL_OK")
</pallas_src>

<mosaic_0001>
module attributes {stable_mosaic.version = 11 : i64} {
  func.func @ffn_kernel(%arg0: i32, %arg1: memref<32x128xf32, #tpu.memory_space<vmem>>, %arg2: memref<128x256xbf16, #tpu.memory_space<vmem>>, %arg3: memref<1x256xf32, #tpu.memory_space<vmem>>, %arg4: memref<256x128xbf16, #tpu.memory_space<vmem>>, %arg5: memref<3x128xf32, #tpu.memory_space<vmem>>, %arg6: memref<32x128xf32, #tpu.memory_space<vmem>>) attributes {dimension_semantics = [#tpu.dimension_semantics<parallel>], iteration_bounds = array<i64: 1>, scalar_prefetch = 0 : i64, scratch_operands = 0 : i64, tpu.core_type = #tpu.core_type<tc>, window_params = [{transform_indices = @transform_0, window_bounds = array<i64: 32, 128>}, {pipeline_mode = #tpu.pipeline_mode<synchronous>, transform_indices = @transform_1, window_bounds = array<i64: 128, 256>}, {pipeline_mode = #tpu.pipeline_mode<synchronous>, transform_indices = @transform_2, window_bounds = array<i64: 1, 256>}, {pipeline_mode = #tpu.pipeline_mode<synchronous>, transform_indices = @transform_3, window_bounds = array<i64: 256, 128>}, {pipeline_mode = #tpu.pipeline_mode<synchronous>, transform_indices = @transform_4, window_bounds = array<i64: 3, 128>}, {transform_indices = @transform_5, window_bounds = array<i64: 32, 128>}]} {
    %c0 = arith.constant 0 : index
    %c0_0 = arith.constant 0 : index
    %0 = vector.load %arg1[%c0, %c0_0] : memref<32x128xf32, #tpu.memory_space<vmem>>, vector<32x128xf32>
    %1 = arith.truncf %0 : vector<32x128xf32> to vector<32x128xbf16>
    %c0_1 = arith.constant 0 : index
    %c0_2 = arith.constant 0 : index
    %2 = vector.load %arg2[%c0_1, %c0_2] : memref<128x256xbf16, #tpu.memory_space<vmem>>, vector<128x256xbf16>
    %cst = arith.constant dense<0.000000e+00> : vector<32x256xf32>
    %3 = tpu.matmul %1, %2, %cst {dimension_numbers = #tpu.dot_dimension_numbers<[1], [0], [0], [1], [0, 0, 1, 1], [], []>} : vector<32x128xbf16>, vector<128x256xbf16>, vector<32x256xf32> -> vector<32x256xf32>
    %c0_3 = arith.constant 0 : index
    %c0_4 = arith.constant 0 : index
    %4 = vector.load %arg3[%c0_3, %c0_4] : memref<1x256xf32, #tpu.memory_space<vmem>>, vector<1x256xf32>
    %5 = vector.broadcast %4 : vector<1x256xf32> to vector<32x256xf32>
    %6 = arith.addf %3, %5 : vector<32x256xf32>
    %cst_5 = arith.constant 0.000000e+00 : f32
    %7 = vector.broadcast %cst_5 : f32 to vector<32x256xf32>
    %8 = arith.maximumf %6, %7 : vector<32x256xf32>
    %9 = arith.truncf %8 : vector<32x256xf32> to vector<32x256xbf16>
    %c0_6 = arith.constant 0 : index
    %c0_7 = arith.constant 0 : index
    %10 = vector.load %arg4[%c0_6, %c0_7] : memref<256x128xbf16, #tpu.memory_space<vmem>>, vector<256x128xbf16>
    %cst_8 = arith.constant dense<0.000000e+00> : vector<32x128xf32>
    %11 = tpu.matmul %9, %10, %cst_8 {dimension_numbers = #tpu.dot_dimension_numbers<[1], [0], [0], [1], [0, 0, 1, 1], [], []>} : vector<32x256xbf16>, vector<256x128xbf16>, vector<32x128xf32> -> vector<32x128xf32>
    %c0_9 = arith.constant 0 : index
    %c0_10 = arith.constant 0 : index
    %12 = vector.load %arg5[%c0_9, %c0_10] : memref<3x128xf32, #tpu.memory_space<vmem>>, vector<1x128xf32>
    %13 = vector.broadcast %12 : vector<1x128xf32> to vector<32x128xf32>
    %14 = arith.addf %11, %13 : vector<32x128xf32>
    %15 = arith.addf %14, %0 : vector<32x128xf32>
    %cst_11 = arith.constant dense<0.000000e+00> : vector<32xf32>
    %16 = vector.multi_reduction <add>, %15, %cst_11 [1] : vector<32x128xf32> to vector<32xf32>
    %17 = vector.shape_cast %16 : vector<32xf32> to vector<32x1xf32>
    %cst_12 = arith.constant 1.280000e+02 : f32
    %18 = vector.broadcast %cst_12 : f32 to vector<32x1xf32>
    %19 = arith.divf %17, %18 : vector<32x1xf32>
    %20 = vector.broadcast %19 : vector<32x1xf32> to vector<32x128xf32>
    %21 = arith.subf %15, %20 : vector<32x128xf32>
    %22 = arith.mulf %21, %21 : vector<32x128xf32>
    %cst_13 = arith.constant dense<0.000000e+00> : vector<32xf32>
    %23 = vector.multi_reduction <add>, %22, %cst_13 [1] : vector<32x128xf32> to vector<32xf32>
    %24 = vector.shape_cast %23 : vector<32xf32> to vector<32x1xf32>
    %cst_14 = arith.constant 1.280000e+02 : f32
    %25 = vector.broadcast %cst_14 : f32 to vector<32x1xf32>
    %26 = arith.divf %24, %25 : vector<32x1xf32>
    %c1 = arith.constant 1 : index
    %c0_15 = arith.constant 0 : index
    %27 = vector.load %arg5[%c1, %c0_15] : memref<3x128xf32, #tpu.memory_space<vmem>>, vector<1x128xf32>
    %28 = vector.broadcast %27 : vector<1x128xf32> to vector<32x128xf32>
    %29 = arith.mulf %28, %21 : vector<32x128xf32>
    %cst_16 = arith.constant 9.99999974E-6 : f32
    %30 = vector.broadcast %cst_16 : f32 to vector<32x1xf32>
    %31 = arith.addf %26, %30 : vector<32x1xf32>
    %32 = math.rsqrt %31 : vector<32x1xf32>
    %33 = vector.broadcast %32 : vector<32x1xf32> to vector<32x128xf32>
    %34 = arith.mulf %29, %33 : vector<32x128xf32>
    %c2 = arith.constant 2 : index
    %c0_17 = arith.constant 0 : index
    %35 = vector.load %arg5[%c2, %c0_17] : memref<3x128xf32, #tpu.memory_space<vmem>>, vector<1x128xf32>
    %36 = vector.broadcast %35 : vector<1x128xf32> to vector<32x128xf32>
    %37 = arith.addf %34, %36 : vector<32x128xf32>
    %c0_18 = arith.constant 0 : index
    %c0_19 = arith.constant 0 : index
    %38 = vector.load %arg6[%c0_18, %c0_19] : memref<32x128xf32, #tpu.memory_space<vmem>>, vector<32x128xf32>
    tpu.vector_store %arg6[%c0_18, %c0_19], %37 {strides = array<i32>} : memref<32x128xf32, #tpu.memory_space<vmem>>, vector<32x128xf32>,
    return
  }
  func.func @transform_0(%arg0: i32) -> (i32, i32) {
    %c0_i32 = arith.constant 0 : i32
    %c0_i32_0 = arith.constant 0 : i32
    return %arg0, %c0_i32 : i32, i32
  }
  func.func @transform_1(%arg0: i32) -> (i32, i32) {
    %c0_i32 = arith.constant 0 : i32
    %c0_i32_0 = arith.constant 0 : i32
    %c0_i32_1 = arith.constant 0 : i32
    return %c0_i32, %c0_i32_0 : i32, i32
  }
  func.func @transform_2(%arg0: i32) -> (i32, i32) {
    %c0_i32 = arith.constant 0 : i32
    %c0_i32_0 = arith.constant 0 : i32
    %c0_i32_1 = arith.constant 0 : i32
    return %c0_i32, %c0_i32_0 : i32, i32
  }
  func.func @transform_3(%arg0: i32) -> (i32, i32) {
    %c0_i32 = arith.constant 0 : i32
    %c0_i32_0 = arith.constant 0 : i32
    %c0_i32_1 = arith.constant 0 : i32
    return %c0_i32, %c0_i32_0 : i32, i32
  }
  func.func @transform_4(%arg0: i32) -> (i32, i32) {
    %c0_i32 = arith.constant 0 : i32
    %c0_i32_0 = arith.constant 0 : i32
    %c0_i32_1 = arith.constant 0 : i32
    return %c0_i32, %c0_i32_0 : i32, i32
  }
  func.func @transform_5(%arg0: i32) -> (i32, i32) {
    %c0_i32 = arith.constant 0 : i32
    %c0_i32_0 = arith.constant 0 : i32
    return %arg0, %c0_i32 : i32, i32
  }
}

</mosaic_0001>

<bundles_post_ra>
// kernel: tpu_custom_call.1
= control target key start
LH: loop header
LB: loop body
LE: loop exit
PB: predicated region body
PF: predicated region fallthrough
CT: control target
= control target key end

     0   :  { %10 = vsyncpa [#allocation3], 0  ;;  %s858_s0 = inlined_call_operand.hbm [shape: f32[32,128], index: 0, kind: input, shape index: {}]   ;;  %s859_s1 = inlined_call_operand.hbm [shape: bf16[128,256], index: 1, kind: input, shape index: {}]   ;;  %s860_s2 = inlined_call_operand.vmem [shape: f32[1,256], index: 2, kind: input, shape index: {}]   ;;  %s861_s3 = inlined_call_operand.hbm [shape: bf16[256,128], index: 3, kind: input, shape index: {}]   ;;  %s862_s4 = inlined_call_operand.vmem [shape: f32[3,128], index: 4, kind: input, shape index: {}]   ;;  %s863_s5 = inlined_call_operand.hbm [shape: f32[32,128], index: 5, kind: output, shape index: {}]  }
   0x1   :  { %11 = vsyncpa [#allocation6], 0 }
   0x2   :  { %12 = vsyncpa [#allocation4], 0  ;;  %s727_s18 = smov [#allocation5]   ;;  %s728_s20 = smov [#allocation2]  }
   0x3   :  { %s30_s19 = sshll.u32 %s727_s18, 4  ;;  %s18_s21 = sshll.u32 %s728_s20, 4  ;;  %s31_s19 = int_to_ptr.vmem [resolvable:$true] %s30_s19  ;;  %s766_s21 = int_to_ptr.vmem [resolvable:$true] %s18_s21 }
   0x4   :  { %s633_s24 = scalar_lea.hbm %s859_s1, 2048 }
   0x5   :  { %p634_p0 = scmp.ne.s32.totalorder %s859_s1, %s633_s24  ;;  %p637_p1 = scmp.lt.u32.totalorder %s633_s24, %s859_s1 }
   0x7   :  { %p639_p2 = pnand %p637_p1, %p634_p0 }
   0x9   :  { %642 = shalt.err (!%p639_p2)
}
   0xa   :  { %s643_s29 = scalar_lea.vmem %s31_s19, 2048  ;;  %p648_p4 = scmp.lt.s32.totalorder %s31_s19, %s31_s19 }
   0xb   :  { %p644_p3 = scmp.ne.s32.totalorder %s31_s19, %s643_s29  ;;  %p649_p5 = scmp.lt.s32.totalorder %s643_s29, %s643_s29 }
   0xd   :  { %p650_p6 = por %p649_p5, %p648_p4 }
   0xf   :  { %p651_p7 = pnand %p650_p6, %p644_p3 }
  0x11   :  { %654 = shalt.err (!%p651_p7)
}
  0x12   :  { %s729_s30 = smov 128   ;;  %s730_s6 = smov 8  }
  0x13   :  { %36 = dma.hbm_to_vmem [thread:$0]  %s859_s1, 2048, %s31_s19, [#allocation6], %s729_s30, %s729_s30, %s730_s6  }
  0x14   :  { %s655_s11 = scalar_lea.hbm %s858_s0, 512 }
  0x15   :  { %p656_p8 = scmp.ne.s32.totalorder %s858_s0, %s655_s11  ;;  %p659_p9 = scmp.lt.u32.totalorder %s655_s11, %s858_s0 }
  0x17   :  { %p661_p10 = pnand %p659_p9, %p656_p8 }
  0x19   :  { %664 = shalt.err (!%p661_p10)
}
  0x1a   :  { %s665_s16 = scalar_lea.vmem %s766_s21, 512  ;;  %p670_p12 = scmp.lt.s32.totalorder %s766_s21, %s766_s21 }
  0x1b   :  { %p666_p11 = scmp.ne.s32.totalorder %s766_s21, %s665_s16  ;;  %p671_p13 = scmp.lt.s32.totalorder %s665_s16, %s665_s16 }
  0x1d   :  { %p672_p0 = por %p671_p13, %p670_p12 }
  0x1f   :  { %p673_p1 = pnand %p672_p0, %p666_p11 }
  0x21   :  { %676 = shalt.err (!%p673_p1)
}
  0x22   :  { %24 = dma.hbm_to_vmem [thread:$0]  %s858_s0, 512, %s766_s21, [#allocation3], %s729_s30, %s729_s30, %s730_s6  }
  0x23   :  { %s731_s18 = smov [#allocation7]   ;;  %s677_s23 = scalar_lea.hbm %s861_s3, 2048 }
  0x24   :  { %s44_s19 = sshll.u32 %s731_s18, 4  ;;  %p678_p2 = scmp.ne.s32.totalorder %s861_s3, %s677_s23  ;;  %s45_s19 = int_to_ptr.vmem [resolvable:$true] %s44_s19 }
  0x25   :  { %p681_p3 = scmp.lt.u32.totalorder %s677_s23, %s861_s3 }
  0x27   :  { %p683_p4 = pnand %p681_p3, %p678_p2 }
  0x29   :  { %686 = shalt.err (!%p683_p4)
}
  0x2a   :  { %s687_s28 = scalar_lea.vmem %s45_s19, 2048  ;;  %p692_p6 = scmp.lt.s32.totalorder %s45_s19, %s45_s19 }
  0x2b   :  { %p688_p5 = scmp.ne.s32.totalorder %s45_s19, %s687_s28  ;;  %p693_p7 = scmp.lt.s32.totalorder %s687_s28, %s687_s28 }
  0x2d   :  { %p694_p8 = por %p693_p7, %p692_p6 }
  0x2f   :  { %p695_p9 = pnand %p694_p8, %p688_p5 }
  0x31   :  { %698 = shalt.err (!%p695_p9)
}
  0x32   :  { %s732_s0 = smov 64   ;;  %s733_s21 = smov 4  }
  0x33   :  { %50 = dma.hbm_to_vmem [thread:$0]  %s861_s3, 2048, %s45_s19, [#allocation6], %s732_s0, %s732_s0, %s733_s21  }
  0x34   :  { %721 = dma.done.wait [#allocation3], 512  }
  0x35   :  { %722 = vsyncadd [#allocation3], 4294966784 }
  0x36   :  { %723 = dma.done.wait [#allocation6], 4096  }
  0x37   :  { %724 = vsyncadd [#allocation6], 4294963200  ;;  %v734_v0 = vmov 0   ;;  %v585_v1 = vld [vmem:[#allocation5 + $0x4] ss:$8 sps:$4 sm:$0xff]   ;;  %v613_v16 = vld [vmem:[#allocation7 + $0x50] sm:$0xff]   ;;  %v87_v39 = vlaneseq }
  0x38   :  { %209 = vmatprep.mubr.bf16.mxu0 %v734_v0  ;;  %v587_v2 = vld [vmem:[#allocation5] ss:$8 sps:$4 sm:$0xff]   ;;  %177 = vmatprep.subr.bf16.mxu0 %v585_v1  ;;  %v588_v3 = vld [vmem:[#allocation5 + $0x14] ss:$8 sps:$4 sm:$0xff]   ;;  %v590_v4 = vld [vmem:[#allocation5 + $0x10] ss:$8 sps:$4 sm:$0xff]  }
  0x39   :  { %178 = vmatpush1.bf16.msra.mxu0 %v587_v2  ;;  %v591_v5 = vld [vmem:[#allocation5 + $0x24] ss:$8 sps:$4 sm:$0xff]   ;;  %v593_v6 = vld [vmem:[#allocation5 + $0x20] ss:$8 sps:$4 sm:$0xff]   ;;  %v594_v7 = vld [vmem:[#allocation5 + $0x34] ss:$8 sps:$4 sm:$0xff]  }
  0x3a   :  { %179 = vmatprep.subr.bf16.mxu0 %v588_v3  ;;  %v596_v8 = vld [vmem:[#allocation5 + $0x30] ss:$8 sps:$4 sm:$0xff]   ;;  %v597_v9 = vld [vmem:[#allocation5 + $0x44] ss:$8 sps:$4 sm:$0xff]   ;;  %v599_v11 = vld [vmem:[#allocation5 + $0x40] ss:$8 sps:$4 sm:$0xff]  }
  0x3b   :  { %v609_v10 = vld [vmem:[#allocation7 + $0x40] sm:$0xff]   ;;  %v600_v13 = vld [vmem:[#allocation5 + $0x54] ss:$8 sps:$4 sm:$0xff]   ;;  %v611_v14 = vld [vmem:[#allocation7 + $0x48] sm:$0xff]   ;;  %v88_v40 = vshrl.u32 %v87_v39, 7  ;;  %s735_s14 = smov [#allocation8]  }
  0x3c   :  { %v610_v12 = vld [vmem:[#allocation7] sm:$0xff]   ;;  %548 = vmatprep.subr.bf16.mxu1 %v609_v10  ;;  %v612_v15 = vld [vmem:[#allocation7 + $0x8] sm:$0xff]   ;;  %v602_v17 = vld [vmem:[#allocation5 + $0x50] ss:$8 sps:$4 sm:$0xff]   ;;  %s500_s15 = sshll.u32 %s735_s14, 4  ;;  %s501_s15 = int_to_ptr.vmem [resolvable:$true] %s500_s15 }
  0x3d   :  { %180 = vmatpush1.bf16.msra.mxu0 %v590_v4  ;;  %549 = vmatpush3.bf16.msra.mxu1 %v610_v12  ;;  %v603_v18 = vld [vmem:[#allocation5 + $0x64] ss:$8 sps:$4 sm:$0xff]   ;;  %v614_v19 = vld [vmem:[#allocation7 + $0x10] sm:$0xff]   ;;  %v615_v20 = vld [vmem:[#allocation7 + $0x58] sm:$0xff]   ;;  %v89_v41 = vsub.s32 0, %v88_v40  ;;  %v93_v43 = vsub.s32 1, %v88_v40  ;;  %p704_p11 = scmp.lt.s32.totalorder %s501_s15, %s501_s15 }
  0x3e   :  { %181 = vmatprep.subr.bf16.mxu0 %v591_v5  ;;  %550 = vmatprep.subr.bf16.mxu1 %v611_v14  ;;  %v605_v21 = vld [vmem:[#allocation5 + $0x60] ss:$8 sps:$4 sm:$0xff]   ;;  %v606_v22 = vld [vmem:[#allocation5 + $0x74] ss:$8 sps:$4 sm:$0xff]   ;;  %v608_v25 = vld [vmem:[#allocation5 + $0x70] ss:$8 sps:$4 sm:$0xff]  }
  0x3f   :  { %v616_v23 = vld [vmem:[#allocation7 + $0x18] sm:$0xff]   ;;  %v617_v24 = vld [vmem:[#allocation7 + $0x60] sm:$0xff]   ;;  %v817_v27 = vld [vmem:[#allocation2 + $0x8] sm:$0xff] }
  0x40   :  { %v815_v26 = vld [vmem:[#allocation2] sm:$0xff]  ;;  %v619_v29 = vld [vmem:[#allocation7 + $0x68] sm:$0xff]   ;;  %v821_v31 = vld [vmem:[#allocation2 + $0x10] sm:$0xff] }
  0x41   :  { %182 = vmatpush1.bf16.msra.mxu0 %v593_v6  ;;  %551 = vmatpush3.bf16.msra.mxu1 %v612_v15  ;;  %v618_v28 = vld [vmem:[#allocation7 + $0x20] sm:$0xff]   ;;  %v67_v30 = vpack.c.bf16 %v817_v27, %v815_v26  ;;  %v823_v32 = vld [vmem:[#allocation2 + $0x18] sm:$0xff]  ;;  %v620_v34 = vld [vmem:[#allocation7 + $0x28] sm:$0xff]  }
  0x42   :  { %183 = vmatprep.subr.bf16.mxu0 %v594_v7  ;;  %552 = vmatprep.subr.bf16.mxu1 %v613_v16  ;;  %v68_v33 = vpack.c.bf16 %v823_v32, %v821_v31  ;;  %v621_v35 = vld [vmem:[#allocation7 + $0x70] sm:$0xff]   ;;  %v623_v37 = vld [vmem:[#allocation7 + $0x78] sm:$0xff]   ;;  %v85_v42 = vld [vmem:[%s860_s2] sm:$0x3] }
  0x43   :  { %v622_v36 = vld [vmem:[#allocation7 + $0x30] sm:$0xff]   ;;  %v624_v38 = vld [vmem:[#allocation7 + $0x38] sm:$0xff]   ;;  %v90_v44 = vrot.slane %v85_v42, %v89_v41  ;;  %v94_v45 = vrot.slane %v85_v42, %v93_v43 }
  0x45   :  { %184 = vmatpush1.bf16.msra.mxu0 %v596_v8  ;;  %553 = vmatpush3.bf16.msra.mxu1 %v614_v19 }
  0x46   :  { %185 = vmatprep.subr.bf16.mxu0 %v597_v9  ;;  %554 = vmatprep.subr.bf16.mxu1 %v615_v20 }
  0x49   :  { %186 = vmatpush1.bf16.msra.mxu0 %v599_v11  ;;  %555 = vmatpush3.bf16.msra.mxu1 %v616_v23  ;;  %v529_v11 = vld [vmem:[%s862_s4] ss:$0 sm:$0xff] }
  0x4a   :  { %187 = vmatprep.subr.bf16.mxu0 %v600_v13  ;;  %556 = vmatprep.subr.bf16.mxu1 %v617_v24 }
  0x4d   :  { %188 = vmatpush1.bf16.msra.mxu0 %v602_v17  ;;  %557 = vmatpush3.bf16.msra.mxu1 %v618_v28 }
  0x4e   :  { %189 = vmatprep.subr.bf16.mxu0 %v603_v18  ;;  %558 = vmatprep.subr.bf16.mxu1 %v619_v29 }
  0x51   :  { %190 = vmatpush1.bf16.msra.mxu0 %v605_v21  ;;  %559 = vmatpush3.bf16.msra.mxu1 %v620_v34 }
  0x52   :  { %191 = vmatprep.subr.bf16.mxu0 %v606_v22  ;;  %560 = vmatprep.subr.bf16.mxu1 %v621_v35 }
  0x55   :  { %192 = vmatpush1.bf16.msra.mxu0 %v608_v25  ;;  %561 = vmatpush3.bf16.msra.mxu1 %v622_v36 }
  0x56   :  { %562 = vmatprep.subr.bf16.mxu1 %v623_v37 }
  0x58   :  { %210 = vmatmul.mubr.bf16.vlgmr.msra.gmra.mrb[0].mxu0 %v67_v30 }
  0x59   :  { %219 = vmatprep.mubr.bf16.mxu0 %v734_v0  ;;  %563 = vmatpush3.bf16.msra.mxu1 %v624_v38 }
  0x60   :  { %220 = vmatmul.mubr.bf16.gmra.mrb[4].mxu0 %v68_v33 }
 0x12b   :  { %v211_v46 = vpop.f32.mrb[0].mxu0 }
 0x12c   :  { %v212_v47 = vadd.f32 %v211_v46, %v90_v44  ;;  %v213_v48 = vpop.f32.mrb[1].mxu0 }
 0x12d   :  { %v214_v49 = vadd.f32 %v213_v48, %v94_v45  ;;  %v215_v50 = vpop.f32.mrb[2].mxu0 }
 0x12e   :  { %v216_v51 = vadd.f32 %v215_v50, %v90_v44  ;;  %v217_v52 = vpop.f32.mrb[3].mxu0  ;;  %v230_v54 = vmax.f32 %v212_v47, 0.0 }
 0x12f   :  { %v218_v53 = vadd.f32 %v217_v52, %v94_v45  ;;  %v231_v56 = vmax.f32 %v214_v49, 0.0 }
 0x130   :  { %v232_v55 = vmax.f32 %v216_v51, 0.0 }
 0x131   :  { %v233_v57 = vmax.f32 %v218_v53, 0.0 }
 0x132   :  { %v238_v58 = vpack.c.bf16 %v232_v55, %v230_v54  ;;  %v546_v55 = vld [vmem:[%s862_s4 + $0x1] ss:$0 sm:$0xff] }
 0x133   :  { %v221_v59 = vpop.f32.mrb[4].mxu0  ;;  %v239_v60 = vpack.c.bf16 %v233_v57, %v231_v56 }
 0x134   :  { %v222_v61 = vadd.f32 %v221_v59, %v90_v44  ;;  %v223_v62 = vpop.f32.mrb[5].mxu0 }
 0x135   :  { %v224_v63 = vadd.f32 %v223_v62, %v94_v45  ;;  %v225_v0 = vpop.f32.mrb[6].mxu0  ;;  %407 = vmatprep.mubr.bf16.mxu1 %v239_v60  ;;  %v547_v62 = vld [vmem:[%s862_s4 + $0x2] ss:$0 sm:$0xff]  ;;  %s699_s4 = scalar_lea.vmem %s501_s15, 512 }
 0x136   :  { %v226_v1 = vadd.f32 %v225_v0, %v90_v44  ;;  %v227_v2 = vpop.f32.mrb[7].mxu0  ;;  %408 = vmatmul.mubr.bf16.vlgmr.msra.gmra.mrb[0].mxu1 %v238_v58  ;;  %v234_v4 = vmax.f32 %v222_v61, 0.0  ;;  %p700_p10 = scmp.ne.s32.totalorder %s501_s15, %s699_s4  ;;  %p705_p12 = scmp.lt.s32.totalorder %s699_s4, %s699_s4 }
 0x137   :  { %v228_v3 = vadd.f32 %v227_v2, %v94_v45  ;;  %v235_v6 = vmax.f32 %v224_v63, 0.0 }
 0x138   :  { %v236_v5 = vmax.f32 %v226_v1, 0.0  ;;  %p706_p13 = por %p705_p12, %p704_p11 }
 0x139   :  { %v237_v7 = vmax.f32 %v228_v3, 0.0 }
 0x13a   :  { %v240_v8 = vpack.c.bf16 %v236_v5, %v234_v4  ;;  %p707_p0 = pnand %p706_p13, %p700_p10 }
 0x13b   :  { %v241_v9 = vpack.c.bf16 %v237_v7, %v235_v6 }
 0x13d   :  { %415 = vmatprep.mubr.bf16.mxu1 %v241_v9 }
 0x13e   :  { %416 = vmatmul.mubr.bf16.gmra.mrb[4].mxu1 %v240_v8 }
 0x209   :  { %v564_v10 = vpop.f32.mrb[0].mxu1 }
 0x20a   :  { %v565_v12 = vpop.f32.mrb[1].mxu1 }
 0x20b   :  { %v566_v13 = vadd.f32 %v565_v12, %v564_v10  ;;  %v567_v14 = vpop.f32.mrb[2].mxu1 }
 0x20c   :  { %v568_v15 = vpop.f32.mrb[3].mxu1 }
 0x20d   :  { %v410_v16 = vadd.f32 %v566_v13, %v529_v11  ;;  %v569_v17 = vadd.f32 %v568_v15, %v567_v14 }
 0x20f   :  { %v413_v18 = vadd.f32 %v569_v17, %v529_v11  ;;  %v424_v19 = vadd.f32 %v410_v16, %v815_v26 }
 0x211   :  { %v570_v20 = vpop.f32.mrb[4].mxu1  ;;  %428 = vadd.xlane.f32.xlu0 %v424_v19  ;;  %v425_v24 = vadd.f32 %v413_v18, %v817_v27 }
 0x212   :  { %v571_v21 = vpop.f32.mrb[5].mxu1 }
 0x213   :  { %v572_v22 = vadd.f32 %v571_v21, %v570_v20  ;;  %v573_v23 = vpop.f32.mrb[6].mxu1 }
 0x214   :  { %v574_v25 = vpop.f32.mrb[7].mxu1 }
 0x215   :  { %v418_v28 = vadd.f32 %v572_v22, %v529_v11  ;;  %v575_v29 = vadd.f32 %v574_v25, %v573_v23  ;;  %430 = vadd.xlane.f32.xlu0 %v425_v24 }
 0x217   :  { %v421_v30 = vadd.f32 %v575_v29, %v529_v11  ;;  %v426_v33 = vadd.f32 %v418_v28, %v821_v31 }
 0x219   :  { %432 = vadd.xlane.f32.xlu1 %v426_v33  ;;  %v427_v34 = vadd.f32 %v421_v30, %v823_v32 }
 0x21d   :  { %434 = vadd.xlane.f32.xlu1 %v427_v34 }
 0x29e   :  { %v429_v35 = vpop.xlane.xlu0 %428 }
 0x29f   :  { %v437_v26 = vmul.f32 0.0078125, %v429_v35 }
 0x2a1   :  { %v441_v36 = vsub.f32 %v424_v19, %v437_v26 }
 0x2a2   :  { %v431_v37 = vpop.xlane.xlu0 %430 }
 0x2a3   :  { %v438_v38 = vmul.f32 0.0078125, %v431_v37  ;;  %v445_v39 = vmul.f32 %v441_v36, %v441_v36  ;;  %v466_v59 = vmul.f32 %v546_v55, %v441_v36 }
 0x2a5   :  { %v442_v40 = vsub.f32 %v425_v24, %v438_v38  ;;  %449 = vadd.xlane.f32.xlu0 %v445_v39 }
 0x2a6   :  { %v433_v27 = vpop.xlane.xlu1 %432 }
 0x2a7   :  { %v439_v41 = vmul.f32 0.0078125, %v433_v27  ;;  %v446_v42 = vmul.f32 %v442_v40, %v442_v40  ;;  %v467_v0 = vmul.f32 %v546_v55, %v442_v40 }
 0x2a9   :  { %v443_v43 = vsub.f32 %v426_v33, %v439_v41  ;;  %451 = vadd.xlane.f32.xlu1 %v446_v42 }
 0x2aa   :  { %v435_v44 = vpop.xlane.xlu1 %434 }
 0x2ab   :  { %v440_v45 = vmul.f32 0.0078125, %v435_v44  ;;  %v447_v31 = vmul.f32 %v443_v43, %v443_v43  ;;  %v468_v4 = vmul.f32 %v546_v55, %v443_v43 }
 0x2ad   :  { %v444_v46 = vsub.f32 %v427_v34, %v440_v45  ;;  %453 = vadd.xlane.f32.xlu0 %v447_v31 }
 0x2af   :  { %v448_v32 = vmul.f32 %v444_v46, %v444_v46  ;;  %v469_v8 = vmul.f32 %v546_v55, %v444_v46 }
 0x2b1   :  { %455 = vadd.xlane.f32.xlu1 %v448_v32 }
 0x332   :  { %v450_v47 = vpop.xlane.xlu0 %449 }
 0x333   :  { %v457_v48 = vmul.f32 0.0078125, %v450_v47 }
 0x335   :  { %v470_v49 = vadd.f32 1e-05, %v457_v48 }
 0x336   :  { %v452_v50 = vpop.xlane.xlu1 %451 }
 0x337   :  { %625 = vrsqrt.f32 %v470_v49  ;;  %v458_v51 = vmul.f32 0.0078125, %v452_v50 }
 0x339   :  { %v471_v52 = vadd.f32 1e-05, %v458_v51 }
 0x33a   :  { %v454_v53 = vpop.xlane.xlu0 %453 }
 0x33b   :  { %627 = vrsqrt.f32 %v471_v52  ;;  %v459_v54 = vmul.f32 0.0078125, %v454_v53 }
 0x33d   :  { %v472_v56 = vadd.f32 1e-05, %v459_v54 }
 0x33e   :  { %v456_v57 = vpop.xlane.xlu1 %455 }
 0x33f   :  { %629 = vrsqrt.f32 %v472_v56  ;;  %v460_v58 = vmul.f32 0.0078125, %v456_v57 }
 0x341   :  { %v626_v60 = vpop.eup %625  ;;  %v473_v61 = vadd.f32 1e-05, %v460_v58 }
 0x342   :  { %v478_v63 = vmul.f32 %v626_v60, %v466_v59 }
 0x343   :  { %631 = vrsqrt.f32 %v473_v61 }
 0x344   :  { %v487_v1 = vadd.f32 %v547_v62, %v478_v63 }
 0x345   :  { %v628_v2 = vpop.eup %627 }
 0x346   :  { %v479_v3 = vmul.f32 %v628_v2, %v467_v0  ;;  %491 = vst [vmem:[#allocation8] sm:$0xff] %v487_v1 }
 0x348   :  { %v488_v5 = vadd.f32 %v547_v62, %v479_v3 }
 0x349   :  { %v630_v6 = vpop.eup %629 }
 0x34a   :  { %v480_v7 = vmul.f32 %v630_v6, %v468_v4  ;;  %492 = vst [vmem:[#allocation8 + $0x8] sm:$0xff] %v488_v5 }
 0x34c   :  { %v489_v9 = vadd.f32 %v547_v62, %v480_v7 }
 0x34d   :  { %v632_v10 = vpop.eup %631 }
 0x34e   :  { %v481_v11 = vmul.f32 %v632_v10, %v469_v8  ;;  %493 = vst [vmem:[#allocation8 + $0x10] sm:$0xff] %v489_v9 }
 0x350   :  { %v490_v12 = vadd.f32 %v547_v62, %v481_v11 }
 0x352   :  { %494 = vst [vmem:[#allocation8 + $0x18] sm:$0xff] %v490_v12 }
 0x353   :  { %710 = shalt.err (!%p707_p0)
}
 0x354   :  { %s711_s17 = scalar_lea.hbm %s863_s5, 512 }
 0x355   :  { %p712_p1 = scmp.ne.s32.totalorder %s863_s5, %s711_s17  ;;  %p715_p2 = scmp.lt.u32.totalorder %s711_s17, %s863_s5 }
 0x357   :  { %p717_p3 = pnand %p715_p2, %p712_p1 }
 0x359   :  { %720 = shalt.err (!%p717_p3)
}
 0x35a   :  { %506 = dma.vmem_to_hbm [thread:$0]  %s501_s15, 512, %s863_s5, [#allocation4], %s729_s30, %s729_s30, %s730_s6  }
 0x35b   :  { %725 = dma.done.wait [#allocation4], 512  }
 0x35c   :  { %726 = vsyncadd [#allocation4], 4294966784 }
 0x35d   :  { %510 = vsyncpa [#allocation3], 1 }
 0x35e   :  { %511 = vsyncpa [#allocation6], 1 }
 0x35f   :  { %512 = vsyncpa [#allocation4], 1 }

</bundles_post_ra>
